<compile_context>
chip_gen: v5e
topology: v5e:2x2
jax: 0.10.0
libtpu: 0.0.40
codegen_flags: <defaults>
</compile_context>

<pallas_src>
import jax
import jax.numpy as jnp
import numpy as np
from jax.experimental import pallas as pl
from jax.experimental.pallas import tpu as pltpu


def _upblock_kernel(x_ref, w_ref, gb_ref, o_ref):
    # x_ref : (1, HW, 9*Cin)   bf16  im2col (3x3 taps folded into lanes) of the
    #                                zero-padded ORIGINAL-resolution input
    # w_ref : (9*Cin, 4*Cout)  bf16  merged sub-pixel weights (4 phases in N)
    # gb_ref: (2, 4*Cout)      f32   row0 = gamma tiled x4, row1 = beta tiled x4
    # o_ref : (1, HW, 4*Cout)  f32   fused conv + InstanceNorm + ReLU output,
    #                                phases packed in lane groups of Cout
    hw = o_ref.shape[1]
    c4 = o_ref.shape[2]
    c = c4 // 4
    inv_n = 1.0 / (4.0 * hw)          # number of upsampled positions (2H)*(2W)

    # Single MXU pass: K = 9*Cin, N = 4*Cout, f32 accumulation.
    acc = jnp.dot(x_ref[0], w_ref[...], preferred_element_type=jnp.float32)

    # InstanceNorm: per-channel mean over HW rows x 4 phase lane-groups.
    colsum = jnp.sum(acc, axis=0, keepdims=True)                     # (1, 4C)
    chan = (colsum[:, 0:c] + colsum[:, c:2 * c]
            + colsum[:, 2 * c:3 * c] + colsum[:, 3 * c:4 * c])       # (1, C)
    mean = chan * inv_n
    mean_b = jnp.concatenate([mean, mean, mean, mean], axis=1)       # (1, 4C)

    cent = acc - mean_b
    sqsum = jnp.sum(cent * cent, axis=0, keepdims=True)              # (1, 4C)
    chan_sq = (sqsum[:, 0:c] + sqsum[:, c:2 * c]
               + sqsum[:, 2 * c:3 * c] + sqsum[:, 3 * c:4 * c])      # (1, C)
    rstd = jax.lax.rsqrt(chan_sq * inv_n + 1e-5)                     # (1, C)
    rstd_b = jnp.concatenate([rstd, rstd, rstd, rstd], axis=1)       # (1, 4C)

    gb = gb_ref[...]
    out = cent * (rstd_b * gb[0:1, :]) + gb[1:2, :]
    o_ref[0] = jnp.maximum(out, 0.0)                                 # ReLU


# Row/col tap-merge matrices for the sub-pixel decomposition.
# A[phase, t, d] == 1 iff 3x3-kernel tap `d` (on the 2x-upsampled grid) lands on
# padded original-resolution offset `t` for output parity `phase`.
_A = np.zeros((2, 3, 3), np.float32)
_A[0, 0, 0] = 1.0
_A[0, 1, 1] = 1.0
_A[0, 1, 2] = 1.0
_A[1, 1, 0] = 1.0
_A[1, 1, 1] = 1.0
_A[1, 2, 2] = 1.0


def up_block2d(x, params):
    """UpBlock2d forward. x: (N, Cin, H, W) float32 (NCHW, like PyTorch)."""
    w, b, gamma, beta = params
    del b  # conv bias cancels exactly under InstanceNorm's mean subtraction
    n, cin, h, wd = x.shape
    cout = w.shape[0]
    hw = h * wd

    # NCHW -> NHWC, zero-pad spatial by 1 at the ORIGINAL resolution.  The 2x
    # nearest upsample is folded into the weights below, so no upsampled
    # activation is ever materialized.
    xh = jnp.transpose(x, (0, 2, 3, 1))
    xp = jnp.pad(xh, ((0, 0), (1, 1), (1, 1), (0, 0)))

    # im2col with the 9 taps folded into the lane (K) axis: (N, HW, 9*Cin).
    taps = [xp[:, ty:ty + h, tx:tx + wd, :]
            for ty in range(3) for tx in range(3)]
    x9 = jnp.concatenate(taps, axis=-1).reshape(n, hw, 9 * cin)
    x9 = x9.astype(jnp.bfloat16)

    # Merged sub-pixel weights:
    #   Wall[(ty*3+tx)*Cin + ci, (py*2+px)*Cout + co]
    #     = sum_{dy,dx} A[py,ty,dy] * A[px,tx,dx] * w[co,ci,dy,dx]
    a = jnp.asarray(_A)
    wall = jnp.einsum("ptd,qse,oide->tsipqo", a, a, w.astype(jnp.float32))
    wall = wall.reshape(9 * cin, 4 * cout).astype(jnp.bfloat16)

    # gamma/beta tiled over the 4 phase lane-groups, merged into one block.
    gb = jnp.stack([jnp.tile(gamma, 4), jnp.tile(beta, 4)]).astype(jnp.float32)

    out = pl.pallas_call(
        _upblock_kernel,
        out_shape=jax.ShapeDtypeStruct((n, hw, 4 * cout), jnp.float32),
        grid=(n,),
        in_specs=[
            pl.BlockSpec((1, hw, 9 * cin), lambda i: (i, 0, 0)),
            pl.BlockSpec((9 * cin, 4 * cout), lambda i: (0, 0)),
            pl.BlockSpec((2, 4 * cout), lambda i: (0, 0)),
        ],
        out_specs=pl.BlockSpec((1, hw, 4 * cout), lambda i: (i, 0, 0)),
        compiler_params=pltpu.CompilerParams(
            dimension_semantics=("parallel",)),
    )(x9, wall, gb)

    # Phase-packed (N, HW, 4*Cout) -> NCHW at 2x resolution:
    # out_up[n, co, 2y+py, 2x+px] = out[n, y*W + x, (py*2+px)*Cout + co]
    out = out.reshape(n, h, wd, 2, 2, cout)
    out = out.transpose(0, 5, 1, 3, 2, 4).reshape(n, cout, 2 * h, 2 * wd)
    return out


def decoder_forward(feature_maps, params_list):
    """Decoder.forward: list of NCHW feature maps -> list of NCHW outputs."""
    xs = list(feature_maps)
    out = xs.pop()
    outs = []
    for params in params_list:
        out = up_block2d(out, params)
        skip = xs.pop()
        out = jnp.concatenate([out, skip], axis=1)   # th.cat(dim=1)
        outs.append(out)
    return outs


# ------------------------- pure-JAX reference ---------------------------------
def _up_block2d_ref(x, params):
    w, b, gamma, beta = params
    x = jnp.repeat(jnp.repeat(x, 2, axis=2), 2, axis=3)
    out = jax.lax.conv_general_dilated(
        x, w, window_strides=(1, 1), padding=((1, 1), (1, 1)),
        dimension_numbers=("NCHW", "OIHW", "NCHW"),
        precision=jax.lax.Precision.HIGHEST)
    out = out + b[None, :, None, None]
    mean = out.mean(axis=(2, 3), keepdims=True)
    var = ((out - mean) ** 2).mean(axis=(2, 3), keepdims=True)
    out = (out - mean) * jax.lax.rsqrt(var + 1e-5)
    out = out * gamma[None, :, None, None] + beta[None, :, None, None]
    return jnp.maximum(out, 0.0)


def _decoder_forward_ref(feature_maps, params_list):
    xs = list(feature_maps)
    out = xs.pop()
    outs = []
    for params in params_list:
        out = _up_block2d_ref(out, params)
        out = jnp.concatenate([out, xs.pop()], axis=1)
        outs.append(out)
    return outs


if __name__ == "__main__":
    # Decoder(block_expansion=4, in_dim=4, num_blocks=3, max_features=256)
    block_expansion = 4
    in_dim = 4
    num_blocks = 3
    max_features = 256
    n = 2
    base_hw = 16

    key = jax.random.PRNGKey(0)

    # Encoder-style feature pyramid (input to Decoder.forward):
    #   x[0]=(2,4,16,16), x[1]=(2,8,8,8), x[2]=(2,16,4,4), x[3]=(2,32,2,2)
    feats = []
    for j in range(num_blocks + 1):
        c = in_dim if j == 0 else min(max_features, block_expansion * 2 ** j)
        s = base_hw // (2 ** j)
        key, kk = jax.random.split(key)
        feats.append(jax.random.normal(kk, (n, c, s, s), jnp.float32))

    # Deterministic parameters for each UpBlock2d (conv w/b, InstanceNorm g/b).
    params_list = []
    for i in reversed(range(num_blocks)):
        block_dim = block_expansion * 2 ** (i + 1)
        in_filters = min(max_features, block_dim)
        if i < num_blocks - 1:
            in_filters *= 2
        out_filters = min(max_features, block_expansion * 2 ** i)
        key, k1, k2, k3, k4 = jax.random.split(key, 5)
        w = 0.1 * jax.random.normal(k1, (out_filters, in_filters, 3, 3), jnp.float32)
        b = 0.1 * jax.random.normal(k2, (out_filters,), jnp.float32)
        gamma = 1.0 + 0.1 * jax.random.normal(k3, (out_filters,), jnp.float32)
        beta = 0.1 * jax.random.normal(k4, (out_filters,), jnp.float32)
        params_list.append((w, b, gamma, beta))

    outs = decoder_forward(feats, params_list)
    outs = jax.block_until_ready(outs)

    refs = jax.block_until_ready(_decoder_forward_ref(feats, params_list))
    for o, r in zip(outs, refs):
        assert o.shape == r.shape, (o.shape, r.shape)
        np.testing.assert_allclose(np.asarray(o), np.asarray(r),
                                   atol=3e-2, rtol=3e-2)

    print("KERNEL_OK")
</pallas_src>

<mosaic_0001>
module attributes {stable_mosaic.version = 11 : i64} {
  func.func @_upblock_kernel(%arg0: i32, %arg1: memref<1x4x288xbf16, #tpu.memory_space<vmem>>, %arg2: memref<288x64xbf16, #tpu.memory_space<vmem>>, %arg3: memref<2x64xf32, #tpu.memory_space<vmem>>, %arg4: memref<1x4x64xf32, #tpu.memory_space<vmem>>) attributes {dimension_semantics = [#tpu.dimension_semantics<parallel>], iteration_bounds = array<i64: 2>, scalar_prefetch = 0 : i64, scratch_operands = 0 : i64, tpu.core_type = #tpu.core_type<tc>, window_params = [{transform_indices = @transform_0, window_bounds = array<i64: 1, 4, 288>}, {pipeline_mode = #tpu.pipeline_mode<synchronous>, transform_indices = @transform_1, window_bounds = array<i64: 288, 64>}, {pipeline_mode = #tpu.pipeline_mode<synchronous>, transform_indices = @transform_2, window_bounds = array<i64: 2, 64>}, {transform_indices = @transform_3, window_bounds = array<i64: 1, 4, 64>}]} {
    %c0 = arith.constant 0 : index
    %c0_0 = arith.constant 0 : index
    %c0_1 = arith.constant 0 : index
    %0 = vector.load %arg1[%c0, %c0_0, %c0_1] : memref<1x4x288xbf16, #tpu.memory_space<vmem>>, vector<1x4x288xbf16>
    %1 = vector.shape_cast %0 : vector<1x4x288xbf16> to vector<4x288xbf16>
    %c0_2 = arith.constant 0 : index
    %c0_3 = arith.constant 0 : index
    %2 = vector.load %arg2[%c0_2, %c0_3] : memref<288x64xbf16, #tpu.memory_space<vmem>>, vector<288x64xbf16>
    %cst = arith.constant dense<0.000000e+00> : vector<4x64xf32>
    %3 = tpu.matmul %1, %2, %cst {dimension_numbers = #tpu.dot_dimension_numbers<[1], [0], [0], [1], [0, 0, 1, 1], [], []>} : vector<4x288xbf16>, vector<288x64xbf16>, vector<4x64xf32> -> vector<4x64xf32>
    %cst_4 = arith.constant dense<0.000000e+00> : vector<64xf32>
    %4 = vector.multi_reduction <add>, %3, %cst_4 [0] : vector<4x64xf32> to vector<64xf32>
    %5 = vector.shape_cast %4 : vector<64xf32> to vector<1x64xf32>
    %6 = vector.extract_strided_slice %5 {offsets = [0, 0], sizes = [1, 16], strides = [1, 1]} : vector<1x64xf32> to vector<1x16xf32>
    %7 = vector.extract_strided_slice %5 {offsets = [0, 16], sizes = [1, 16], strides = [1, 1]} : vector<1x64xf32> to vector<1x16xf32>
    %8 = arith.addf %6, %7 : vector<1x16xf32>
    %9 = vector.extract_strided_slice %5 {offsets = [0, 32], sizes = [1, 16], strides = [1, 1]} : vector<1x64xf32> to vector<1x16xf32>
    %10 = arith.addf %8, %9 : vector<1x16xf32>
    %11 = vector.extract_strided_slice %5 {offsets = [0, 48], sizes = [1, 16], strides = [1, 1]} : vector<1x64xf32> to vector<1x16xf32>
    %12 = arith.addf %10, %11 : vector<1x16xf32>
    %cst_5 = arith.constant 6.250000e-02 : f32
    %13 = vector.broadcast %cst_5 : f32 to vector<1x16xf32>
    %14 = arith.mulf %12, %13 : vector<1x16xf32>
    %15 = tpu.concatenate %14, %14, %14, %14 in 1 : vector<1x16xf32>, vector<1x16xf32>, vector<1x16xf32>, vector<1x16xf32> -> vector<1x64xf32>
    %16 = vector.broadcast %15 : vector<1x64xf32> to vector<4x64xf32>
    %17 = arith.subf %3, %16 : vector<4x64xf32>
    %18 = arith.mulf %17, %17 : vector<4x64xf32>
    %cst_6 = arith.constant dense<0.000000e+00> : vector<64xf32>
    %19 = vector.multi_reduction <add>, %18, %cst_6 [0] : vector<4x64xf32> to vector<64xf32>
    %20 = vector.shape_cast %19 : vector<64xf32> to vector<1x64xf32>
    %21 = vector.extract_strided_slice %20 {offsets = [0, 0], sizes = [1, 16], strides = [1, 1]} : vector<1x64xf32> to vector<1x16xf32>
    %22 = vector.extract_strided_slice %20 {offsets = [0, 16], sizes = [1, 16], strides = [1, 1]} : vector<1x64xf32> to vector<1x16xf32>
    %23 = arith.addf %21, %22 : vector<1x16xf32>
    %24 = vector.extract_strided_slice %20 {offsets = [0, 32], sizes = [1, 16], strides = [1, 1]} : vector<1x64xf32> to vector<1x16xf32>
    %25 = arith.addf %23, %24 : vector<1x16xf32>
    %26 = vector.extract_strided_slice %20 {offsets = [0, 48], sizes = [1, 16], strides = [1, 1]} : vector<1x64xf32> to vector<1x16xf32>
    %27 = arith.addf %25, %26 : vector<1x16xf32>
    %cst_7 = arith.constant 6.250000e-02 : f32
    %28 = vector.broadcast %cst_7 : f32 to vector<1x16xf32>
    %29 = arith.mulf %27, %28 : vector<1x16xf32>
    %cst_8 = arith.constant 9.99999974E-6 : f32
    %30 = vector.broadcast %cst_8 : f32 to vector<1x16xf32>
    %31 = arith.addf %29, %30 : vector<1x16xf32>
    %32 = math.rsqrt %31 : vector<1x16xf32>
    %33 = tpu.concatenate %32, %32, %32, %32 in 1 : vector<1x16xf32>, vector<1x16xf32>, vector<1x16xf32>, vector<1x16xf32> -> vector<1x64xf32>
    %c0_9 = arith.constant 0 : index
    %c0_10 = arith.constant 0 : index
    %34 = vector.load %arg3[%c0_9, %c0_10] : memref<2x64xf32, #tpu.memory_space<vmem>>, vector<2x64xf32>
    %35 = vector.extract_strided_slice %34 {offsets = [0, 0], sizes = [1, 64], strides = [1, 1]} : vector<2x64xf32> to vector<1x64xf32>
    %36 = arith.mulf %33, %35 : vector<1x64xf32>
    %37 = vector.broadcast %36 : vector<1x64xf32> to vector<4x64xf32>
    %38 = arith.mulf %17, %37 : vector<4x64xf32>
    %39 = vector.extract_strided_slice %34 {offsets = [1, 0], sizes = [1, 64], strides = [1, 1]} : vector<2x64xf32> to vector<1x64xf32>
    %40 = vector.broadcast %39 : vector<1x64xf32> to vector<4x64xf32>
    %41 = arith.addf %38, %40 : vector<4x64xf32>
    %cst_11 = arith.constant 0.000000e+00 : f32
    %42 = vector.broadcast %cst_11 : f32 to vector<4x64xf32>
    %43 = arith.maximumf %41, %42 : vector<4x64xf32>
    %c0_12 = arith.constant 0 : index
    %c0_13 = arith.constant 0 : index
    %c0_14 = arith.constant 0 : index
    %44 = vector.load %arg4[%c0_12, %c0_13, %c0_14] : memref<1x4x64xf32, #tpu.memory_space<vmem>>, vector<1x4x64xf32>
    %45 = vector.shape_cast %44 : vector<1x4x64xf32> to vector<4x64xf32>
    %46 = vector.shape_cast %43 : vector<4x64xf32> to vector<1x4x64xf32>
    tpu.vector_store %arg4[%c0_12, %c0_13, %c0_14], %46 {strides = array<i32>} : memref<1x4x64xf32, #tpu.memory_space<vmem>>, vector<1x4x64xf32>,
    return
  }
  func.func @transform_0(%arg0: i32) -> (i32, i32, i32) {
    %c0_i32 = arith.constant 0 : i32
    %c0_i32_0 = arith.constant 0 : i32
    %c0_i32_1 = arith.constant 0 : i32
    return %arg0, %c0_i32, %c0_i32_0 : i32, i32, i32
  }
  func.func @transform_1(%arg0: i32) -> (i32, i32) {
    %c0_i32 = arith.constant 0 : i32
    %c0_i32_0 = arith.constant 0 : i32
    %c0_i32_1 = arith.constant 0 : i32
    return %c0_i32, %c0_i32_0 : i32, i32
  }
  func.func @transform_2(%arg0: i32) -> (i32, i32) {
    %c0_i32 = arith.constant 0 : i32
    %c0_i32_0 = arith.constant 0 : i32
    %c0_i32_1 = arith.constant 0 : i32
    return %c0_i32, %c0_i32_0 : i32, i32
  }
  func.func @transform_3(%arg0: i32) -> (i32, i32, i32) {
    %c0_i32 = arith.constant 0 : i32
    %c0_i32_0 = arith.constant 0 : i32
    %c0_i32_1 = arith.constant 0 : i32
    return %arg0, %c0_i32, %c0_i32_0 : i32, i32, i32
  }
}

</mosaic_0001>

<bundles_post_ra>
// kernel: tpu_custom_call.1
= control target key start
LH: loop header
LB: loop body
LE: loop exit
PB: predicated region body
PF: predicated region fallthrough
CT: control target
= control target key end

     0   :  { %8 = vsyncpa [#allocation3], 0  ;;  %s935_s0 = inlined_call_operand.vmem [shape: bf16[2,4,288], index: 0, kind: input, shape index: {}]   ;;  %s936_s1 = inlined_call_operand.vmem [shape: bf16[288,64], index: 1, kind: input, shape index: {}]   ;;  %s937_s2 = inlined_call_operand.vmem [shape: f32[2,64], index: 2, kind: input, shape index: {}]   ;;  %s938_s3 = inlined_call_operand.hbm [shape: f32[2,4,64], index: 3, kind: output, shape index: {}]  }
   0x1   :  { %10 = vsyncpa [#allocation3 + $0x1], 0  ;;  %s771_s12 = smov 0   ;;  %s773_s13 = smov 0  }
   0x2   :  { %s775_s14 = smov 0   ;;  %s777_s15 = smov 0  }
   0x3 LB: > { %s792_s16 = sadd.s32 4294967295, %s743_s15   ;;  %s532_s17 = sadd.s32 4294967294, %s743_s15   ;;  %s743_s15 = sphi %s777_s15, %s944_s15   ;;  %s739_s14 = sphi %s775_s14, %s943_s14   ;;  %s735_s13 = sphi %s773_s13, %s942_s13   ;;  %s731_s12 = sphi %s771_s12, %s941_s12  }
   0x4   : > { %s796_s18 = sadd.s32 1, %s743_s15   ;;  %s91_s19 = sadd.s32 1, %s739_s14 }
   0x5   : > { %s88_s20 = ssub.s32 %s743_s15, %s796_s18  ;;  %p101_p0 = scmp.ne.s32.totalorder %s739_s14, %s735_s13 }
   0x6   : > { %p89_p1 = scmp.eq.s32.totalorder %s88_s20, 0  ;;  %p102_p2 = scmp.eq.s32.totalorder %s792_s16, 1 }
   0x7   : > { %p107_p3 = scmp.ne.s32.totalorder %s735_s13, %s731_s12  ;;  %p108_p4 = scmp.eq.s32.totalorder %s532_s17, 1 }
   0x8   : > { %s807_s21 = scalar_select %p89_p1, %s739_s14, %s91_s19  }
   0x9   : > { %p809_p5 = por %p102_p2, %p101_p0  ;;  %p813_p6 = por %p108_p4, %p107_p3 }
   0xa   : > { %p535_p7 = scmp.ge.s32.totalorder %s743_s15, 1  ;;  %p140_p8 = scmp.lt.s32.totalorder %s743_s15, 3 }
   0xc   : > { %p141_p9 = pnand %p535_p7, %p140_p8 }
   0xd   : > { %p164_p10 = scmp.lt.s32.totalorder (!%p141_p9), %s792_s16, 1  ;;  %s745_s29 = smov (!%p141_p9), 80  }
   0xe   : > { %144 = sbr.rel (%p141_p9) target bundleno = 737 (0x2e1), region = 32  ;;  %s746_s30 = smov (!%p141_p9), 112  }
   0xf   : > { %s747_s4 = smov (!%p141_p9), 96   ;;  %s748_s5 = smov (!%p141_p9), 32  }
  0x10   : > { %s749_s6 = smov (!%p141_p9), 16   ;;  %s161_s8 = sand.u32 (!%p141_p9), 1, %s735_s13  }
  0x11   : > { %s536_s11 = sshll.u32 (!%p141_p9), %s161_s8, 2  ;;  %s612_s17 = sshll.u32 (!%p141_p9), %s792_s16, 2 }
  0x12   : > { %s468_s24 = scalar_lea.hbm (!%p141_p9), %s938_s3, %s612_s17  ;;  %s163_s25 = scalar_lea.vmem (!%p141_p9), [#allocation2], %s536_s11 }
  0x13   : > { %v622_v0 = vld [vmem:[%s936_s1 + $0x38] sm:$0xff]  ;;  %v621_v2 = vld [vmem:[%s936_s1 + $0x30] sm:$0xff]  ;;  %v632_v4 = vld [vmem:[%s936_s1 + $0x88] sm:$0xff]  ;;  %s165_s7 = scalar_select %p164_p10, %s792_s16, 1  ;;  %vm322_vm0 = vcmask 261120   ;;  %vm364_vm1 = vcmask 519168  }
  0x14   : > { %v630_v1 = vld [vmem:[%s936_s1 + $0x78] sm:$0xff]  ;;  %325 = vmatpush.bf16.msra.mxu0 %v622_v0  ;;  %v629_v3 = vld [vmem:[%s936_s1 + $0x70] sm:$0xff]  ;;  %357 = vmatpush.bf16.msra.mxu2 %v632_v4  ;;  %v631_v5 = vld [vmem:[%s936_s1 + $0x80] sm:$0xff]  ;;  %vm396_vm2 = vcmask 130048   ;;  %vm399_vm3 = vcmask 392192   ;;  %s472_s27 = sshll.u32 %s468_s24, 4  ;;  %s473_s27 = int_to_ptr.hbm [resolvable:$true] %s472_s27 }
  0x15   : > { %338 = vmatpush.bf16.msra.mxu1 %v630_v1  ;;  %s633_s10 = smul.u32 6, %s165_s7  ;;  %v620_v6 = vld [vmem:[%s936_s1 + $0x28] sm:$0xff]  ;;  %v619_v9 = vld [vmem:[%s936_s1 + $0x20] sm:$0xff]  ;;  %v618_v11 = vld [vmem:[%s936_s1 + $0x18] sm:$0xff]  ;;  %s750_s7 = smov 48  }
  0x16   : > { %v628_v7 = vld [vmem:[%s936_s1 + $0x68] sm:$0xff]  ;;  %v627_v10 = vld [vmem:[%s936_s1 + $0x60] sm:$0xff]  ;;  %v626_v12 = vld [vmem:[%s936_s1 + $0x58] sm:$0xff]  ;;  %s458_s28 = scalar_lea.sflag [#allocation3], %s161_s8  ;;  %s695_s16 = sshra.s32 %s473_s27, 4  ;;  %s696_s16 = int_to_ptr.hbm [resolvable:$true] %s695_s16 }
  0x17   : > { %s168_s26 = scalar_lea.vmem %s935_s0, %s633_s10  ;;  %v617_v14 = vld [vmem:[%s936_s1 + $0x10] sm:$0xff]  ;;  %v616_v16 = vld [vmem:[%s936_s1 + $0x8] sm:$0xff]  ;;  %v615_v18 = vld [vmem:[%s936_s1] sm:$0xff]  ;;  %p702_p0 = scmp.lt.s32.totalorder %s696_s16, %s938_s3 }
  0x18   : > { %326 = vmatpush.bf16.msra.mxu0 %v621_v2  ;;  %v170_v8 = vld [vmem:[%s168_s26] sm:$0x3f]  ;;  %358 = vmatpush.bf16.msra.mxu2 %v631_v5  ;;  %v625_v15 = vld [vmem:[%s936_s1 + $0x50] sm:$0xff]  ;;  %v624_v17 = vld [vmem:[%s936_s1 + $0x48] sm:$0xff]  ;;  %s470_s26 = sshll.u32 %s163_s25, 4  ;;  %s471_s26 = int_to_ptr.vmem [resolvable:$true] %s470_s26 }
  0x19   : > { %339 = vmatpush.bf16.msra.mxu1 %v629_v3  ;;  %208 = vst [vmem:[#allocation1] ss:$4 sm:$0xff] %v170_v8  ;;  %v623_v19 = vld [vmem:[%s936_s1 + $0x40] sm:$0xff] }
  0x1c   : > { %327 = vmatpush.bf16.msra.mxu0 %v620_v6 }
  0x1d   : > { %340 = vmatpush.bf16.msra.mxu1 %v628_v7 }
  0x20   : > { %328 = vmatpush.bf16.msra.mxu0 %v619_v9  ;;  %v211_v13 = vld.sshfl [vmem:[#allocation1 + $0x10] sm:$0xff pattern:$0x73625140]  ;;  %v209_v20 = vld.sshfl [vmem:[#allocation1] sm:$0xff pattern:$0x73625140] }
  0x21   : > { %341 = vmatpush.bf16.msra.mxu1 %v627_v10  ;;  %610 = vmatmul.msk.bf16.vlgmr.msra.gmra.mxu2 %vm322_vm0, %v211_v13  ;;  %v210_v21 = vld.sshfl [vmem:[#allocation1 + $0x8] sm:$0xff pattern:$0x73625140]  ;;  %v449_v13 = vld [vmem:[%s937_s2] sm:$0x3] }
  0x24   : > { %329 = vmatpush.bf16.msra.mxu0 %v618_v11 }
  0x25   : > { %342 = vmatpush.bf16.msra.mxu1 %v626_v12 }
  0x28   : > { %330 = vmatpush.bf16.msra.mxu0 %v617_v14 }
  0x29   : > { %343 = vmatpush.bf16.msra.mxu1 %v625_v15 }
  0x2c   : > { %331 = vmatpush.bf16.msra.mxu0 %v616_v16 }
  0x2d   : > { %344 = vmatpush.bf16.msra.mxu1 %v624_v17 }
  0x30   : > { %332 = vmatpush.bf16.msra.mxu0 %v615_v18 }
  0x31   : > { %345 = vmatpush.bf16.msra.mxu1 %v623_v19  ;;  %v453_v19 = vperm.slane %v449_v13, 1 }
  0x33   : > { %333 = vmatmul.bf16.vlgmr.msra.gmra.mxu0 %v209_v20 }
  0x34   : > { %346 = vmatmul.bf16.vlgmr.msra.gmra.mxu1 %v210_v21 }
  0xa4   : > { %v360_v22 = vpop.f32.mrf.mxu2 }
  0xac   : > { %v362_v23 = vpop.f32.mrf.mxu2 }
  0xb0   : > { %v334_v24 = vpop.f32.mrf.mxu0 }
  0xb1   : > { %v347_v25 = vpop.f32.mrf.mxu1 }
  0xb2   : > { %v348_v26 = vadd.f32 %v347_v25, %v334_v24 }
  0xb4   : > { %v361_v27 = vadd.f32 %v360_v22, %v348_v26 }
  0xb6   : > { %v365_v28 = vsel %vm364_vm1, %v361_v27, 0.0 }
  0xb7   : > { %v366_v29 = vrot.slane %v365_v28, 4 }
  0xb8   : > { %v336_v31 = vpop.f32.mrf.mxu0 }
  0xb9   : > { %v367_v30 = vadd.f32 %v366_v29, %v365_v28  ;;  %v349_v32 = vpop.f32.mrf.mxu1 }
  0xbb   : > { %v368_v33 = vrot.slane %v367_v30, 2 }
  0xbd   : > { %v369_v34 = vadd.f32 %v368_v33, %v367_v30 }
  0xbf   : > { %v370_v35 = vrot.slane %v369_v34, 1 }
  0xc1   : > { %v371_v36 = vadd.f32 %v370_v35, %v369_v34 }
  0xc3   : > { %381 = vrot.lane.b32.xlu1 %v371_v36, %s745_s29  ;;  %373 = vrot.lane.b32.xlu0 %v371_v36, %s746_s30 }
  0xcb   : > { %377 = vrot.lane.b32.xlu0 %v371_v36, %s747_s4 }
 0x135   : > { %v374_v37 = vpop.permute.xlu0 %373  ;;  %v382_v41 = vpop.permute.xlu1 %381 }
 0x136   : > { %v376_v38 = vadd.f32 %v374_v37, %v371_v36 }
 0x13d   : > { %v378_v39 = vpop.permute.xlu0 %377 }
 0x13e   : > { %v380_v40 = vadd.f32 %v378_v39, %v376_v38 }
 0x140   : > { %v384_v42 = vadd.f32 %v382_v41, %v380_v40 }
 0x142   : > { %v385_v43 = vmul.f32 0.0625, %v384_v42 }
 0x144   : > { %390 = vrot.lane.b32.xlu2 %v385_v43, %s748_s5  ;;  %387 = vrot.lane.b32.xlu1 %v385_v43, %s749_s6 }
 0x14c   : > { %393 = vrot.lane.b32.xlu2 %v385_v43, %s750_s7 }
 0x19e   : > { %v391_v44 = vpop.permute.xlu2 %390 }
 0x1a6   : > { %v394_v47 = vpop.permute.xlu2 %393 }
 0x1b6   : > { %v388_v45 = vpop.permute.xlu1 %387 }
 0x1b7   : > { %v397_v46 = vsel %vm396_vm2, %v385_v43, %v388_v45 }
 0x1b8   : > { %v398_v48 = vsel %vm322_vm0, %v397_v46, %v391_v44 }
 0x1b9   : > { %v400_v49 = vsel %vm399_vm3, %v398_v48, %v394_v47 }
 0x1ba   : > { %v401_v50 = vperm.slane %v400_v49, 0 }
 0x1bc   : > { %v402_v51 = vsub.f32 %v361_v27, %v401_v50 }
 0x1be   : > { %v403_v52 = vmul.f32 %v402_v51, %v402_v51 }
 0x1c0   : > { %v404_v53 = vsel %vm364_vm1, %v403_v52, 0.0 }
 0x1c1   : > { %v405_v54 = vrot.slane %v404_v53, 4 }
 0x1c3   : > { %v406_v55 = vadd.f32 %v405_v54, %v404_v53 }
 0x1c5   : > { %v407_v56 = vrot.slane %v406_v55, 2 }
 0x1c7   : > { %v408_v57 = vadd.f32 %v407_v56, %v406_v55 }
 0x1c9   : > { %v409_v58 = vrot.slane %v408_v57, 1 }
 0x1cb   : > { %v410_v59 = vadd.f32 %v409_v58, %v408_v57 }
 0x1cd   : > { %420 = vrot.lane.b32.xlu2 %v410_v59, %s745_s29  ;;  %416 = vrot.lane.b32.xlu1 %v410_v59, %s747_s4  ;;  %s697_s29 = scalar_lea.hbm %s696_s16, 4 }
 0x1ce   : > { %412 = vrot.lane.b32.xlu0 %v410_v59, %s746_s30  ;;  %p698_p11 = scmp.ne.s32.totalorder %s696_s16, %s697_s29 }
 0x1d0   : > { %p699_p12 = pnand %p698_p11, %p809_p5 }
 0x1d2   : > { %p700_p13 = pneg %p699_p12 }
 0x227   : > { %v421_v0 = vpop.permute.xlu2 %420 }
 0x23f   : > { %v417_v62 = vpop.permute.xlu1 %416 }
 0x240   : > { %v413_v60 = vpop.permute.xlu0 %412 }
 0x241   : > { %v415_v61 = vadd.f32 %v413_v60, %v410_v59 }
 0x243   : > { %v419_v63 = vadd.f32 %v417_v62, %v415_v61 }
 0x245   : > { %v423_v1 = vadd.f32 %v421_v0, %v419_v63 }
 0x247   : > { %v424_v2 = vmul.f32 0.0625, %v423_v1 }
 0x249   : > { %v425_v3 = vadd.f32 1e-05, %v424_v2 }
 0x24b   : > { %679 = vrsqrt.f32 %v425_v3  ;;  %vm432_vm5 = vweird.f32 %v425_v3 }
 0x251   : > { %v680_v4 = vpop.eup %679 }
 0x252   : > { %v427_v5 = vmul.f32 %v680_v4, %v425_v3  ;;  %vm433_vm4 = vweird.f32 %v680_v4 }
 0x253   : > { %vm434_vm6 = vmor %vm432_vm5, %vm433_vm4 }
 0x254   : > { %v428_v6 = vmul.f32 %v680_v4, %v427_v5 }
 0x256   : > { %v429_v7 = vmul.f32 0.5, %v428_v6 }
 0x258   : > { %v430_v8 = vsub.f32 1.5, %v429_v7 }
 0x25a   : > { %v431_v9 = vmul.f32 %v680_v4, %v430_v8 }
 0x25c   : > { %v435_v10 = vsel %vm434_vm6, %v680_v4, %v431_v9 }
 0x25d   : > { %443 = vrot.lane.b32.xlu2 %v435_v10, %s750_s7  ;;  %440 = vrot.lane.b32.xlu1 %v435_v10, %s748_s5  ;;  %s701_s5 = scalar_lea.hbm %s938_s3, 8 }
 0x25e   : > { %437 = vrot.lane.b32.xlu0 %v435_v10, %s749_s6  ;;  %p703_p1 = scmp.lt.s32.totalorder %s701_s5, %s697_s29 }
 0x260   : > { %p704_p2 = por %p703_p1, %p702_p0 }
 0x262   : > { %p705_p3 = pnand %p704_p2, %p700_p13 }
 0x2b7   : > { %v444_v15 = vpop.permute.xlu2 %443 }
 0x2cf   : > { %v441_v11 = vpop.permute.xlu1 %440 }
 0x2d0   : > { %v438_v12 = vpop.permute.xlu0 %437 }
 0x2d1   : > { %v446_v14 = vsel %vm396_vm2, %v435_v10, %v438_v12 }
 0x2d2   : > { %v447_v16 = vsel %vm322_vm0, %v446_v14, %v441_v11 }
 0x2d3   : > { %v448_v17 = vsel %vm399_vm3, %v447_v16, %v444_v15 }
 0x2d4   : > { %v450_v18 = vmul.f32 %v449_v13, %v448_v17 }
 0x2d6   : > { %v451_v20 = vperm.slane %v450_v18, 0 }
 0x2d8   : > { %v452_v21 = vmul.f32 %v451_v20, %v402_v51 }
 0x2da   : > { %v454_v22 = vadd.f32 %v453_v19, %v452_v21 }
 0x2dc   : > { %v455_v23 = vmax.f32 %v454_v22, 0.0 }
 0x2de   : > { %456 = vst.msk [vmem:[%s163_s25] sm:$0xf] %vm364_vm1, %v455_v23 }
 0x2df   : > { %708 = shalt.err (!%p705_p3)
}
 0x2e0   : > { %634 = dma.vmem_to_hbm [thread:$0]  (%p809_p5), %s471_s26, 64, %s473_s27, %s458_s28  }
 0x2e1 PF: > { %p640_p4 = scmp.ge.s32.totalorder %s743_s15, 2  ;;  %s484_s8 = sand.u32 1, %s731_s12  }
 0x2e2   : > { %s485_s9 = scalar_lea.sflag [#allocation3], %s484_s8 }
 0x2e3   : > { %p637_p7 = pnand %p640_p4, %p813_p6 }
 0x2e5   : > { %p638_p8 = pneg %p637_p7 }
 0x2e7   : > { %726 = dma.done.wait (%p638_p8), %s485_s9, 64  }
 0x2e8   : > { %728 = vsyncadd (%p638_p8), %s485_s9, 4294967232  ;;  %p13_p9 = scmp.ge.s32.totalorder %s796_s18, 4   ;;  %s941_s12 = smov %s735_s13 }
 0x2e9   : > { %s942_s13 = smov %s739_s14  ;;  %s943_s14 = smov %s807_s21 }
 0x2ea   : > { %s944_s15 = smov %s796_s18  ;;  %15 = sbr.rel (!%p13_p9) target bundleno = 3 (0x3), region = 67 }
 0x2ef   :  { %491 = vsyncpa [#allocation3], 1 }
 0x2f0   :  { %493 = vsyncpa [#allocation3 + $0x1], 1 }

</bundles_post_ra>
